<compile_context>
chip_gen: v7x
topology: tpu7x:2x2x1
jax: 0.10.0
libtpu: 0.0.40
codegen_flags: <defaults>
</compile_context>

<pallas_src>
import functools
import math

import jax
import jax.numpy as jnp
from jax.experimental import pallas as pl
from jax.experimental.pallas import tpu as pltpu


def _round_up(x, m):
    return ((x + m - 1) // m) * m


def _vmem_limit(block_bytes):
    # Blocks are tiny; leave generous slack but stay well under v7x's 64 MiB/TC.
    return int(min(48 * 2**20, max(16 * 2**20, 4 * block_bytes)))


def _apply_activation(y, activation):
    if activation == "relu":
        return jnp.maximum(y, 0.0)
    if activation == "tanh":
        return jnp.tanh(y)
    return y  # activation is None -> identity


def _conv_body(x_cat, w_ref, b_ref, o_ref, *, kernel_size, out_width, activation):
    """x_cat: (C_in, >= out_width + K - 1) window; lanes = length axis.

    Single MXU contraction over K*C_in:
        y[o, t] = sum_{k,i} W2[o, k*C_in + i] * x_cat[i, t + k]
    """
    views = [x_cat[:, k:k + out_width] for k in range(kernel_size)]
    xs = views[0] if kernel_size == 1 else jnp.concatenate(views, axis=0)
    y = jnp.dot(w_ref[...], xs, preferred_element_type=jnp.float32)  # (C_out, out_width)
    y = y + b_ref[...]                                               # (C_out, 1) broadcast
    y = _apply_activation(y, activation)
    o_ref[0] = y.astype(o_ref.dtype)


def _kernel_tiled(xm_ref, xh_ref, w_ref, b_ref, o_ref, *,
                  kernel_size, l_tile, activation):
    """Grid = (batch, L_out tiles).  NCL layout, L on the lane axis.

    xm_ref: (1, C_in, l_tile)   main input tile (columns [l*l_tile, l*l_tile+l_tile))
    xh_ref: (1, C_in, 128)      halo view of the same array starting at (l+1)*l_tile
                                (block index clamped to stay in-bounds)
    w_ref : (C_out, K*C_in)     affine-folded, flattened conv weight (resident)
    b_ref : (C_out, 1)          affine-folded bias (resident)
    o_ref : (1, C_out, l_tile)  lane-dense output tile
    """
    x_cat = jnp.concatenate([xm_ref[0], xh_ref[0]], axis=-1)  # (C_in, l_tile + 128)
    _conv_body(x_cat, w_ref, b_ref, o_ref,
               kernel_size=kernel_size, out_width=l_tile, activation=activation)


def _kernel_single(x_ref, w_ref, b_ref, o_ref, *, kernel_size, l_out, activation):
    """Single-tile path (L_out <= l_tile): full-length blocks, no halo, no padding."""
    _conv_body(x_ref[0], w_ref, b_ref, o_ref,
               kernel_size=kernel_size, out_width=l_out, activation=activation)


def norm_conv_forward(x_ncl, weight, bias, factor, term, *,
                      activation=None, l_tile=1024):
    """x_ncl: (B, C_in, L) fp32; weight: (C_out, C_in, K); bias/factor/term: (C_out,).

    Returns (B, C_out, L_out), L_out = L - K + 1 (stride=1, padding=0), matching the
    nn.Conv1d defaults used by NormConv, followed by factor*y + term and activation.
    """
    B, C_in, L = x_ncl.shape
    C_out, C_in_w, K = weight.shape
    assert C_in_w == C_in
    L_out = L - K + 1
    assert L_out >= 1

    # Fold the per-channel affine into the conv parameters (tiny transform):
    #   factor * (W x + b) + term == (factor ⊙ W) x + (factor * b + term)
    w_eff = weight * factor[:, None, None]                     # (C_out, C_in, K)
    b_eff = factor * bias + term                               # (C_out,)
    # Flatten for the single K*C_in contraction; stacked-operand row = k*C_in + i.
    w2 = jnp.transpose(w_eff, (0, 2, 1)).reshape(C_out, K * C_in)
    b2 = b_eff.reshape(C_out, 1)

    # Sanitize requested tile: multiple of 128, capped so the (C_out, l_tile) f32
    # result + K shifted windows stay well inside the 64-entry vreg file.
    l_tile = _round_up(max(128, min(int(l_tile), 2048)), 128)

    out_shape = jax.ShapeDtypeStruct((B, C_out, L_out), x_ncl.dtype)

    if L_out <= l_tile:
        # --- Single-tile path: blocks equal the full array dims (always legal),
        # no halo view needed, no partial blocks anywhere.
        kernel = functools.partial(_kernel_single, kernel_size=K,
                                   l_out=L_out, activation=activation)
        block_bytes = 4 * (2 * C_in * L + 2 * C_out * L_out + C_out * (K * C_in + 1))
        return pl.pallas_call(
            kernel,
            out_shape=out_shape,
            grid_spec=pltpu.PrefetchScalarGridSpec(
                num_scalar_prefetch=0,
                grid=(B,),
                in_specs=[
                    pl.BlockSpec((1, C_in, L), lambda b: (b, 0, 0)),
                    pl.BlockSpec((C_out, K * C_in), lambda b: (0, 0)),
                    pl.BlockSpec((C_out, 1), lambda b: (0, 0)),
                ],
                out_specs=pl.BlockSpec((1, C_out, L_out), lambda b: (b, 0, 0)),
            ),
            compiler_params=pltpu.CompilerParams(
                dimension_semantics=("parallel",),
                vmem_limit_bytes=_vmem_limit(block_bytes)),
        )(x_ncl, w2, b2)

    # --- Multi-tile path: L_out > l_tile >= 128.
    num_tiles = pl.cdiv(L_out, l_tile)
    halo_stride = l_tile // 128            # halo block index per L tile (128-lane units)
    max_halo_blk = (L - 1) // 128          # last 128-block whose start is < L

    def x_main_map(b, l):
        return (b, 0, l)

    def x_halo_map(b, l):
        # Halo = first 128 input columns after the main tile, i.e. block index
        # (l+1)*halo_stride in 128-lane units.  Clamp so the block is always at
        # least partially in-bounds; whenever the clamp fires, the main tile
        # already contains every input column needed by valid outputs.
        return (b, 0, jnp.minimum((l + 1) * halo_stride, max_halo_blk))

    kernel = functools.partial(_kernel_tiled, kernel_size=K,
                               l_tile=l_tile, activation=activation)
    block_bytes = 4 * (2 * C_in * (l_tile + 128) + 2 * C_out * l_tile
                       + C_out * (K * C_in + 1))
    return pl.pallas_call(
        kernel,
        out_shape=out_shape,
        grid_spec=pltpu.PrefetchScalarGridSpec(
            num_scalar_prefetch=0,
            grid=(B, num_tiles),
            in_specs=[
                pl.BlockSpec((1, C_in, l_tile), x_main_map),
                pl.BlockSpec((1, C_in, 128), x_halo_map),
                pl.BlockSpec((C_out, K * C_in), lambda b, l: (0, 0)),
                pl.BlockSpec((C_out, 1), lambda b, l: (0, 0)),
            ],
            out_specs=pl.BlockSpec((1, C_out, l_tile), lambda b, l: (b, 0, l)),
        ),
        compiler_params=pltpu.CompilerParams(
            dimension_semantics=("parallel", "parallel"),
            vmem_limit_bytes=_vmem_limit(block_bytes)),
    )(x_ncl, x_ncl, w2, b2)


def _reference(x_ncl, weight, bias, factor, term, activation=None):
    """Pure-JAX reference mirroring the PyTorch forward."""
    y = jax.lax.conv_general_dilated(
        x_ncl, weight, window_strides=(1,), padding="VALID",
        dimension_numbers=("NCH", "OIH", "NCH"))       # (B, C_out, L_out)
    y = y + bias[None, :, None]
    y = jnp.transpose(y, (0, 2, 1))                    # (B, L_out, C_out)
    y = factor * y + term
    if activation == "relu":
        y = jnp.maximum(y, 0.0)
    elif activation == "tanh":
        y = jnp.tanh(y)
    return jnp.transpose(y, (0, 2, 1))


if __name__ == "__main__":
    key = jax.random.PRNGKey(0)

    # Small shapes consistent with the module: Conv1d(in_channels=4, out_channels=6, kernel_size=3)
    B, C_in, C_out, K, L = 2, 4, 6, 3, 16

    k_x, k_v, k_x2, k_x3 = jax.random.split(key, 4)

    # Deterministic parameter init (use_bayesian=False path of NormConv):
    #   kaiming_normal_(weight, nonlinearity='relu'), bias = 0, then weight_norm(dim=None).
    fan_in = C_in * K
    std = math.sqrt(2.0 / fan_in)
    v = jax.random.normal(k_v, (C_out, C_in, K), jnp.float32) * std
    g = jnp.sqrt(jnp.sum(v * v))                 # weight_norm with dim=None: scalar g = ||v||
    weight = g * v / jnp.sqrt(jnp.sum(v * v))    # effective weight (== v at init)
    bias = jnp.zeros((C_out,), jnp.float32)

    factor = jnp.ones((C_out,), jnp.float32)     # nn.Parameter(torch.ones(out_channels))
    term = jnp.ones((C_out,), jnp.float32) * 0.1 # nn.Parameter(torch.ones(out_channels) * 0.1)

    # 1) Tiny L -> single-tile path (full-dim blocks, no halo, no padding).
    x = jax.random.normal(k_x, (B, C_in, L), jnp.float32)      # NCL, like PyTorch Conv1d input
    out = jax.block_until_ready(
        norm_conv_forward(x, weight, bias, factor, term, activation="relu"))
    ref = _reference(x, weight, bias, factor, term, activation="relu")
    assert out.shape == (B, C_out, L - K + 1), out.shape
    assert jnp.allclose(out, ref, atol=1e-4, rtol=1e-4), float(jnp.max(jnp.abs(out - ref)))

    # 2) Multi-tile path with a ragged final tile (tests halo clamp + masked tail writeback).
    L2 = 300
    x2 = jax.random.normal(k_x2, (B, C_in, L2), jnp.float32)
    out2 = jax.block_until_ready(
        norm_conv_forward(x2, weight, bias, factor, term, activation="tanh", l_tile=128))
    ref2 = _reference(x2, weight, bias, factor, term, activation="tanh")
    assert out2.shape == (B, C_out, L2 - K + 1), out2.shape
    assert jnp.allclose(out2, ref2, atol=1e-4, rtol=1e-4), float(jnp.max(jnp.abs(out2 - ref2)))

    # 3) Multi-tile path where L_out is an exact multiple of the tile (halo genuinely used
    #    across the tile boundary and partially in-bounds on the last tile).
    L3 = 258
    x3 = jax.random.normal(k_x3, (B, C_in, L3), jnp.float32)
    out3 = jax.block_until_ready(
        norm_conv_forward(x3, weight, bias, factor, term, activation=None, l_tile=128))
    ref3 = _reference(x3, weight, bias, factor, term, activation=None)
    assert out3.shape == (B, C_out, L3 - K + 1), out3.shape
    assert jnp.allclose(out3, ref3, atol=1e-4, rtol=1e-4), float(jnp.max(jnp.abs(out3 - ref3)))

    print("KERNEL_OK")
</pallas_src>

<mosaic_0001>
module attributes {stable_mosaic.version = 11 : i64} {
  func.func @_kernel_single(%arg0: i32, %arg1: memref<1x4x16xf32, #tpu.memory_space<vmem>>, %arg2: memref<6x12xf32, #tpu.memory_space<vmem>>, %arg3: memref<6x1xf32, #tpu.memory_space<vmem>>, %arg4: memref<1x6x14xf32, #tpu.memory_space<vmem>>) attributes {dimension_semantics = [#tpu.dimension_semantics<parallel>], iteration_bounds = array<i64: 2>, scalar_prefetch = 0 : i64, scratch_operands = 0 : i64, tpu.core_type = #tpu.core_type<tc>, window_params = [{transform_indices = @transform_0, window_bounds = array<i64: 1, 4, 16>}, {pipeline_mode = #tpu.pipeline_mode<synchronous>, transform_indices = @transform_1, window_bounds = array<i64: 6, 12>}, {pipeline_mode = #tpu.pipeline_mode<synchronous>, transform_indices = @transform_2, window_bounds = array<i64: 6, 1>}, {transform_indices = @transform_3, window_bounds = array<i64: 1, 6, 14>}]} {
    %c0 = arith.constant 0 : index
    %c0_0 = arith.constant 0 : index
    %c0_1 = arith.constant 0 : index
    %0 = vector.load %arg1[%c0, %c0_0, %c0_1] : memref<1x4x16xf32, #tpu.memory_space<vmem>>, vector<1x4x16xf32>
    %1 = vector.shape_cast %0 : vector<1x4x16xf32> to vector<4x16xf32>
    %2 = vector.extract_strided_slice %1 {offsets = [0, 0], sizes = [4, 14], strides = [1, 1]} : vector<4x16xf32> to vector<4x14xf32>
    %3 = vector.extract_strided_slice %1 {offsets = [0, 1], sizes = [4, 14], strides = [1, 1]} : vector<4x16xf32> to vector<4x14xf32>
    %4 = vector.extract_strided_slice %1 {offsets = [0, 2], sizes = [4, 14], strides = [1, 1]} : vector<4x16xf32> to vector<4x14xf32>
    %5 = tpu.concatenate %2, %3, %4 in 0 : vector<4x14xf32>, vector<4x14xf32>, vector<4x14xf32> -> vector<12x14xf32>
    %c0_2 = arith.constant 0 : index
    %c0_3 = arith.constant 0 : index
    %6 = vector.load %arg2[%c0_2, %c0_3] : memref<6x12xf32, #tpu.memory_space<vmem>>, vector<6x12xf32>
    %cst = arith.constant dense<0.000000e+00> : vector<6x14xf32>
    %7 = tpu.matmul %6, %5, %cst {dimension_numbers = #tpu.dot_dimension_numbers<[1], [0], [0], [1], [0, 0, 1, 1], [], []>} : vector<6x12xf32>, vector<12x14xf32>, vector<6x14xf32> -> vector<6x14xf32>
    %c0_4 = arith.constant 0 : index
    %c0_5 = arith.constant 0 : index
    %8 = vector.load %arg3[%c0_4, %c0_5] : memref<6x1xf32, #tpu.memory_space<vmem>>, vector<6x1xf32>
    %9 = vector.broadcast %8 : vector<6x1xf32> to vector<6x14xf32>
    %10 = arith.addf %7, %9 : vector<6x14xf32>
    %cst_6 = arith.constant 0.000000e+00 : f32
    %11 = vector.broadcast %cst_6 : f32 to vector<6x14xf32>
    %12 = arith.maximumf %10, %11 : vector<6x14xf32>
    %c0_7 = arith.constant 0 : index
    %c0_8 = arith.constant 0 : index
    %c0_9 = arith.constant 0 : index
    %13 = vector.load %arg4[%c0_7, %c0_8, %c0_9] : memref<1x6x14xf32, #tpu.memory_space<vmem>>, vector<1x6x14xf32>
    %14 = vector.shape_cast %13 : vector<1x6x14xf32> to vector<6x14xf32>
    %15 = vector.shape_cast %12 : vector<6x14xf32> to vector<1x6x14xf32>
    tpu.vector_store %arg4[%c0_7, %c0_8, %c0_9], %15 {strides = array<i32>} : memref<1x6x14xf32, #tpu.memory_space<vmem>>, vector<1x6x14xf32>,
    return
  }
  func.func @transform_0(%arg0: i32) -> (i32, i32, i32) {
    %c0_i32 = arith.constant 0 : i32
    %c0_i32_0 = arith.constant 0 : i32
    %c0_i32_1 = arith.constant 0 : i32
    return %arg0, %c0_i32, %c0_i32_0 : i32, i32, i32
  }
  func.func @transform_1(%arg0: i32) -> (i32, i32) {
    %c0_i32 = arith.constant 0 : i32
    %c0_i32_0 = arith.constant 0 : i32
    %c0_i32_1 = arith.constant 0 : i32
    return %c0_i32, %c0_i32_0 : i32, i32
  }
  func.func @transform_2(%arg0: i32) -> (i32, i32) {
    %c0_i32 = arith.constant 0 : i32
    %c0_i32_0 = arith.constant 0 : i32
    %c0_i32_1 = arith.constant 0 : i32
    return %c0_i32, %c0_i32_0 : i32, i32
  }
  func.func @transform_3(%arg0: i32) -> (i32, i32, i32) {
    %c0_i32 = arith.constant 0 : i32
    %c0_i32_0 = arith.constant 0 : i32
    %c0_i32_1 = arith.constant 0 : i32
    return %arg0, %c0_i32, %c0_i32_0 : i32, i32, i32
  }
}

</mosaic_0001>

<bundles_post_ra>
// kernel: tpu_custom_call.1
= control target key start
LH: loop header
LB: loop body
LE: loop exit
PB: predicated region body
PF: predicated region fallthrough
CT: control target
= control target key end

     0   :  { %8 = vsyncpa [#allocation3], 0  ;;  %s463_s12 = smov 0   ;;  %s526_s0 = inlined_call_operand.vmem [shape: f32[2,4,16], index: 0, kind: input, shape index: {}]   ;;  %s527_s1 = inlined_call_operand.hbm [shape: f32[6,12], index: 1, kind: input, shape index: {}]   ;;  %s528_s2 = inlined_call_operand.vmem [shape: f32[6,1], index: 2, kind: input, shape index: {}]   ;;  %s529_s3 = inlined_call_operand.vmem [shape: f32[2,6,14], index: 3, kind: output, shape index: {}]  }
   0x1 LB: > { %s469_s13 = sadd.s32 4294967295, %s433_s12   ;;  %p342_p0 = scmp.ge.s32.totalorder %s433_s12, 1  ;;  %s433_s12 = sphi %s463_s12, %s14_s12  }
   0x2   : > { %p113_p1 = scmp.lt.s32.totalorder %s433_s12, 3  ;;  %p530_p3 = scmp.eq.s32.totalorder %s469_s13, 0 }
   0x3   : > { %s435_s15 = smov [#allocation2]   ;;  %s395_s20 = scalar_lea.hbm %s527_s1, 128 }
   0x4   : > { %p473_p2 = pnand %p342_p0, %p113_p1  ;;  %s126_s16 = sshll.u32 %s435_s15, 4  ;;  %s127_s16 = int_to_ptr.vmem [resolvable:$true] %s126_s16 }
   0x5   : > { %p396_p6 = scmp.ne.s32.totalorder %s527_s1, %s395_s20  ;;  %p402_p10 = scmp.lt.u32.totalorder %s395_s20, %s527_s1 }
   0x6   : > { %s532_s14 = scalar_select %p473_p2, 1, 0 }
   0x7   : > { %p371_p4 = pneg %p473_p2 }
   0x9   : > { %p482_p5 = pnand %p530_p3, %p371_p4 }
   0xb   : > { %p397_p7 = pneg %p482_p5 }
   0xd   : > { %p398_p8 = pnand %p397_p7, %p396_p6 }
   0xf   : > { %p399_p9 = pneg %p398_p8 }
  0x11   : > { %p404_p11 = pnand %p402_p10, %p399_p9 }
  0x13   : > { %407 = shalt.err (!%p404_p11)
}
  0x14   : > { %s408_s25 = scalar_lea.vmem %s127_s16, 128  ;;  %p416_p1 = scmp.lt.s32.totalorder %s127_s16, %s127_s16 }
  0x15   : > { %p409_p12 = scmp.ne.s32.totalorder %s127_s16, %s408_s25  ;;  %p417_p4 = scmp.lt.s32.totalorder %s408_s25, %s408_s25 }
  0x17   : > { %p411_p13 = pnand %p409_p12, %p397_p7  ;;  %p418_p3 = por %p417_p4, %p416_p1 }
  0x19   : > { %p412_p0 = pneg %p411_p13 }
  0x1b   : > { %p419_p2 = pnand %p418_p3, %p412_p0 }
  0x1d   : > { %422 = shalt.err (!%p419_p2)
}
  0x1e   : > { %374 = dma.hbm_to_vmem [thread:$0]  (!%p482_p5), %s527_s1, 128, %s127_s16, [#allocation3]  }
  0x1f   : > { %p534_p6 = scmp.ne.s32.totalorder %s532_s14, 0 }
  0x20   : > { %p535_p8 = scmp.eq.s32.totalorder (!%p534_p6), %s469_s13, 0 }
  0x21   : > { %149 = sbr.rel (%p534_p6) target bundleno = 390 (0x186), region = 32 }
  0x28   : > { %428 = dma.done.wait (%p535_p8), [#allocation3], 128   ;;  %p536_p7 = pmov %p535_p8 }
  0x29   : > { %p171_p9 = scmp.lt.s32.totalorder %s469_s13, 1  ;;  %v436_v0 = vmov 0.0|0.0   ;;  %vm437_vm0 = vmmov 0   ;;  %v438_v1 = vmov 0.0   ;;  %v439_v3 = vmov 0   ;;  %s440_s7 = smov 127  }
  0x2a   : > { %430 = vsyncadd (%p536_p7), [#allocation3], 4294967168  ;;  %363 = vmatprep.subr.bf16.mxu0 %v436_v0  ;;  %360 = vmatprep.mubr.msk.f32.mxu0 %vm437_vm0, %v438_v1  ;;  %v190_v4 = vld [vmem:[%s528_s2] sm:$0x3f]  ;;  %s441_s8 = smov 126   ;;  %vm187_vm1 = vcmask 1043456  }
  0x2b   : > { %s538_s13 = smov (!%p171_p9, %s469_s13), 1  ;;  %393 = vset.pattern.permute.xlu1 %v439_v3  ;;  %394 = vset.pattern.permute.xlu0 %v439_v3  ;;  %vm442_vm2 = vmmov 1   ;;  %v189_v10 = vld [vmem:[#allocation2] sm:$0x3f]  ;;  %vm196_vm4 = vcmask 97280   ;;  %vm273_vm5 = vcmask 111616  }
  0x2c   : > { %s347_s28 = sshll.u32 %s538_s13, 2  ;;  %193 = vperm.xlu1 %393, %v190_v4   ;;  %vm365_vm3 = vmpackc.low %vm187_vm1, %vm442_vm2  ;;  %s348_s9 = sshll.u32 %s538_s13, 3 }
  0x2d   : > { %s174_s4 = scalar_lea.vmem %s526_s0, %s347_s28  ;;  %s178_s14 = scalar_lea.vmem %s529_s3, %s348_s9 }
  0x2e   : > { %v179_v2 = vld [vmem:[%s174_s4] sm:$0xf] }
  0x2f   : > { %v181_v5 = vrot.slane %v179_v2, 4 }
  0x31   : > { %182 = vrot.lane.b32.xlu0 %v181_v5, %s440_s7 }
  0x35   : > { %185 = vrot.lane.b32.xlu0 %v179_v2, %s441_s8 }
  0xa3   : > { %v183_v6 = vpop.permute.xlu0 %182 }
  0xa4   : > { %v188_v7 = vsel %vm187_vm1, %v179_v2, %v183_v6 }
  0xa7   : > { %v186_v8 = vpop.permute.xlu0 %185 }
  0xa8   : > { %v364_v9 = vpack.c.bf16 %v186_v8, %v188_v7 }
  0xaa   : > { %366 = vmatpush3.bf16.msk.msra.mxu0 %vm365_vm3, %v364_v9 }
  0xab   : > { %v194_v11 = vpop.permute.xlu1 %193 }
  0xad   : > { %361 = vmatmul.mubr.msk.f32.vlgmr.msra.gmra.mrb[0].mxu0 %vm196_vm4, %v189_v10 }
 0x180   : > { %v268_v12 = vpop.f32.mrb[0].mxu0 }
 0x181   : > { %v269_v13 = vadd.f32 %v268_v12, %v194_v11  ;;  %v362_v14 = vpop.f32.mrb[1].mxu0 }
 0x183   : > { %v272_v15 = vmax.f32 %v269_v13, 0.0 }
 0x185   : > { %274 = vst.msk [vmem:[%s178_s14] sm:$0x3f] %vm273_vm5, %v272_v15 }
 0x186 PF: > { %s14_s12 = sadd.s32 1, %s433_s12  }
 0x187   : > { %p11_p2 = scmp.ge.s32.totalorder %s14_s12, 4  }
 0x189   :  { %13 = sbr.rel (!%p11_p2) target bundleno = 1 (0x1), region = 67 }
 0x190   :  { %294 = vsyncpa [#allocation3], 1 }
 0x191   :  { %296 = vsyncpa [#allocation3 + $0x1], 1 }

</bundles_post_ra>
